<compile_context>
chip_gen: v7x
topology: tpu7x:2x2x1
jax: 0.10.0
libtpu: 0.0.40
codegen_flags: <defaults>
</compile_context>

<pallas_src>
import jax
import jax.numpy as jnp
from jax.experimental import pallas as pl
from jax.experimental.pallas import tpu as pltpu

LANE = 128       # TPU lane width: pad all feature dims to a multiple of this
SUBLANE = 8      # sublane granularity for the batch tile
TB_MAX = 512     # max batch tile (amortizes ~0.35us/step grid overhead)


def _round_up(n, m):
    return ((n + m - 1) // m) * m


def _mlp_kernel(x_ref, w1_ref, wmid_ref, w5_ref, b_ref, o_ref):
    """One batch tile: q = W5.(ReLU(...ReLU(W1.x + b1)...)) + b5 (lane-padded).

    Dots run bf16 x bf16 on the MXU with f32 accumulation; bias + ReLU in f32.
    """
    hid = w1_ref.shape[1]   # padded hidden width (multiple of 128)
    out = w5_ref.shape[1]   # padded output width (multiple of 128)

    h = jnp.dot(x_ref[...], w1_ref[...], preferred_element_type=jnp.float32)
    h = jnp.maximum(h + b_ref[0:1, :hid], 0.0)
    # Three hidden->hidden ReLU layers; tiny static unroll.
    for i in range(3):
        h = jnp.dot(h.astype(jnp.bfloat16), wmid_ref[i],
                    preferred_element_type=jnp.float32)
        h = jnp.maximum(h + b_ref[i + 1:i + 2, :hid], 0.0)
    q = jnp.dot(h.astype(jnp.bfloat16), w5_ref[...],
                preferred_element_type=jnp.float32) + b_ref[4:5, :out]
    o_ref[...] = q.astype(o_ref.dtype)


def init_params(key, linear_dim, hidden_dim, action_dim, w_init=0.003):
    """Unpadded f32 params matching the torch layer shapes (weights [in,out])."""
    dims = [(linear_dim, hidden_dim),
            (hidden_dim, hidden_dim),
            (hidden_dim, hidden_dim),
            (hidden_dim, hidden_dim),
            (hidden_dim, action_dim)]
    params = []
    for i, (fan_in, fan_out) in enumerate(dims):
        key, kw, kb = jax.random.split(key, 3)
        bound = w_init if i == len(dims) - 1 else 1.0 / float(fan_in) ** 0.5
        w = jax.random.uniform(kw, (fan_in, fan_out), jnp.float32, -bound, bound)
        b = jax.random.uniform(kb, (1, fan_out), jnp.float32, -bound, bound)
        params.append((w, b))
    return params


def pack_params(params):
    """Zero-pad feature dims to lane width, cast weights to bf16, pack ONCE."""
    (w1, b1), (w2, b2), (w3, b3), (w4, b4), (w5, b5) = params
    linear_dim, hidden_dim = w1.shape
    action_dim = w5.shape[1]
    lin_pad = _round_up(linear_dim, LANE)
    hid_pad = _round_up(hidden_dim, LANE)
    out_pad = _round_up(action_dim, LANE)

    def pad2(w, rows, cols):
        buf = jnp.zeros((rows, cols), jnp.float32)
        buf = buf.at[:w.shape[0], :w.shape[1]].set(w.astype(jnp.float32))
        return buf.astype(jnp.bfloat16)

    w1p = pad2(w1, lin_pad, hid_pad)                                     # [lin_pad, hid_pad] bf16
    wmid = jnp.stack([pad2(w, hid_pad, hid_pad) for w in (w2, w3, w4)])  # [3, hid_pad, hid_pad] bf16
    w5p = pad2(w5, hid_pad, out_pad)                                     # [hid_pad, out_pad] bf16

    # Biases packed into one f32 (8, bwidth) slab (bias/ReLU math stays f32).
    bwidth = max(hid_pad, out_pad)
    b_slab = jnp.zeros((8, bwidth), jnp.float32)
    for i, bi in enumerate((b1, b2, b3, b4, b5)):
        b_slab = b_slab.at[i, :bi.shape[1]].set(bi[0].astype(jnp.float32))

    return w1p, wmid, w5p, b_slab, lin_pad, hid_pad, out_pad, action_dim


def soft_q_forward(state, packed, tb_max=TB_MAX):
    """state: [B, 1, H, W] float32 (NCHW). Returns Q-values [B, action_dim] f32."""
    w1p, wmid, w5p, b_slab, lin_pad, hid_pad, out_pad, action_dim = packed
    B = state.shape[0]
    x = state.reshape(B, -1)
    lin = x.shape[1]

    # Batch tile: big enough to amortize grid overhead, capped at ceil(B/2)
    # (rounded to a sublane multiple) so v7x gets >=2 grid steps when possible.
    tb = min(tb_max, max(SUBLANE, _round_up((B + 1) // 2, SUBLANE)))
    b_pad = _round_up(B, tb)
    grid = (b_pad // tb,)

    # Stream x in bf16.  Pad only what is strictly needed: when linear_dim is
    # already lane-aligned and B is a tile multiple this is a pure cast.
    x = x.astype(jnp.bfloat16)
    if b_pad != B or lin_pad != lin:
        x = jnp.pad(x, ((0, b_pad - B), (0, lin_pad - lin)))

    out = pl.pallas_call(
        _mlp_kernel,
        out_shape=jax.ShapeDtypeStruct((b_pad, out_pad), jnp.float32),
        grid=grid,
        in_specs=[
            # Activations: tiled over the batch grid axis (double-buffered).
            pl.BlockSpec((tb, lin_pad), lambda i: (i, 0)),
            # Weights/biases: same block every step -> VMEM-resident, DMA'd once.
            pl.BlockSpec(w1p.shape, lambda i: (0, 0)),
            pl.BlockSpec(wmid.shape, lambda i: (0, 0, 0)),
            pl.BlockSpec(w5p.shape, lambda i: (0, 0)),
            pl.BlockSpec(b_slab.shape, lambda i: (0, 0)),
        ],
        out_specs=pl.BlockSpec((tb, out_pad), lambda i: (i, 0)),
        compiler_params=pltpu.CompilerParams(
            dimension_semantics=("parallel",)),  # batch tiles are independent
    )(x, w1p, wmid, w5p, b_slab)

    return out[:B, :action_dim]


if __name__ == "__main__":
    # Small shapes consistent with the module: state_dim = (16, 16) grid,
    # batch=2, hidden_dim=32, action_dim=4.  (At B=2 the call is latency
    # dominated; the kernel pays off at rollout batches >= a few hundred.)
    B, H, W = 2, 16, 16
    hidden_dim, action_dim = 32, 4
    linear_dim = H * W

    key = jax.random.PRNGKey(0)
    key, k_state = jax.random.split(key)
    state = jax.random.normal(k_state, (B, 1, H, W), dtype=jnp.float32)  # NCHW

    params = init_params(key, linear_dim, hidden_dim, action_dim)
    packed = pack_params(params)  # pad/pack/cast once, outside the kernel

    fwd = jax.jit(lambda s: soft_q_forward(s, packed))
    q = fwd(state)
    jax.block_until_ready(q)

    # Pure-JAX reference with the SAME bf16 quantization points as the kernel
    # (bf16 matmul operands, f32 accumulation, f32 bias/ReLU).
    h = state.reshape(B, -1).astype(jnp.bfloat16)
    for i, (w, b) in enumerate(params):
        h = jnp.dot(h, w.astype(jnp.bfloat16),
                    preferred_element_type=jnp.float32) + b[0]
        if i < len(params) - 1:
            h = jnp.maximum(h, 0.0).astype(jnp.bfloat16)
    ref = h

    assert q.shape == (B, action_dim)
    assert jnp.allclose(q, ref, atol=1e-3, rtol=1e-3), "mismatch vs bf16 reference"

    print("KERNEL_OK")
</pallas_src>

<mosaic_0001>
module attributes {stable_mosaic.version = 11 : i64} {
  func.func @_mlp_kernel(%arg0: i32, %arg1: memref<8x256xbf16, #tpu.memory_space<vmem>>, %arg2: memref<256x128xbf16, #tpu.memory_space<vmem>>, %arg3: memref<3x128x128xbf16, #tpu.memory_space<vmem>>, %arg4: memref<128x128xbf16, #tpu.memory_space<vmem>>, %arg5: memref<8x128xf32, #tpu.memory_space<vmem>>, %arg6: memref<8x128xf32, #tpu.memory_space<vmem>>) attributes {dimension_semantics = [#tpu.dimension_semantics<parallel>], iteration_bounds = array<i64: 1>, scalar_prefetch = 0 : i64, scratch_operands = 0 : i64, tpu.core_type = #tpu.core_type<tc>, window_params = [{transform_indices = @transform_0, window_bounds = array<i64: 8, 256>}, {pipeline_mode = #tpu.pipeline_mode<synchronous>, transform_indices = @transform_1, window_bounds = array<i64: 256, 128>}, {pipeline_mode = #tpu.pipeline_mode<synchronous>, transform_indices = @transform_2, window_bounds = array<i64: 3, 128, 128>}, {pipeline_mode = #tpu.pipeline_mode<synchronous>, transform_indices = @transform_3, window_bounds = array<i64: 128, 128>}, {pipeline_mode = #tpu.pipeline_mode<synchronous>, transform_indices = @transform_4, window_bounds = array<i64: 8, 128>}, {transform_indices = @transform_5, window_bounds = array<i64: 8, 128>}]} {
    %c0 = arith.constant 0 : index
    %c0_0 = arith.constant 0 : index
    %0 = vector.load %arg1[%c0, %c0_0] : memref<8x256xbf16, #tpu.memory_space<vmem>>, vector<8x256xbf16>
    %c0_1 = arith.constant 0 : index
    %c0_2 = arith.constant 0 : index
    %1 = vector.load %arg2[%c0_1, %c0_2] : memref<256x128xbf16, #tpu.memory_space<vmem>>, vector<256x128xbf16>
    %cst = arith.constant dense<0.000000e+00> : vector<8x128xf32>
    %2 = tpu.matmul %0, %1, %cst {dimension_numbers = #tpu.dot_dimension_numbers<[1], [0], [0], [1], [0, 0, 1, 1], [], []>} : vector<8x256xbf16>, vector<256x128xbf16>, vector<8x128xf32> -> vector<8x128xf32>
    %c0_3 = arith.constant 0 : index
    %c0_4 = arith.constant 0 : index
    %3 = vector.load %arg5[%c0_3, %c0_4] : memref<8x128xf32, #tpu.memory_space<vmem>>, vector<1x128xf32>
    %4 = vector.broadcast %3 : vector<1x128xf32> to vector<8x128xf32>
    %5 = arith.addf %2, %4 : vector<8x128xf32>
    %cst_5 = arith.constant 0.000000e+00 : f32
    %6 = vector.broadcast %cst_5 : f32 to vector<8x128xf32>
    %7 = arith.maximumf %5, %6 : vector<8x128xf32>
    %8 = arith.truncf %7 : vector<8x128xf32> to vector<8x128xbf16>
    %c0_6 = arith.constant 0 : index
    %c0_7 = arith.constant 0 : index
    %c0_8 = arith.constant 0 : index
    %9 = vector.load %arg3[%c0_6, %c0_7, %c0_8] : memref<3x128x128xbf16, #tpu.memory_space<vmem>>, vector<1x128x128xbf16>
    %10 = vector.shape_cast %9 : vector<1x128x128xbf16> to vector<128x128xbf16>
    %cst_9 = arith.constant dense<0.000000e+00> : vector<8x128xf32>
    %11 = tpu.matmul %8, %10, %cst_9 {dimension_numbers = #tpu.dot_dimension_numbers<[1], [0], [0], [1], [0, 0, 1, 1], [], []>} : vector<8x128xbf16>, vector<128x128xbf16>, vector<8x128xf32> -> vector<8x128xf32>
    %c1 = arith.constant 1 : index
    %c0_10 = arith.constant 0 : index
    %12 = vector.load %arg5[%c1, %c0_10] : memref<8x128xf32, #tpu.memory_space<vmem>>, vector<1x128xf32>
    %13 = vector.broadcast %12 : vector<1x128xf32> to vector<8x128xf32>
    %14 = arith.addf %11, %13 : vector<8x128xf32>
    %cst_11 = arith.constant 0.000000e+00 : f32
    %15 = vector.broadcast %cst_11 : f32 to vector<8x128xf32>
    %16 = arith.maximumf %14, %15 : vector<8x128xf32>
    %17 = arith.truncf %16 : vector<8x128xf32> to vector<8x128xbf16>
    %c1_12 = arith.constant 1 : index
    %c0_13 = arith.constant 0 : index
    %c0_14 = arith.constant 0 : index
    %18 = vector.load %arg3[%c1_12, %c0_13, %c0_14] : memref<3x128x128xbf16, #tpu.memory_space<vmem>>, vector<1x128x128xbf16>
    %19 = vector.shape_cast %18 : vector<1x128x128xbf16> to vector<128x128xbf16>
    %cst_15 = arith.constant dense<0.000000e+00> : vector<8x128xf32>
    %20 = tpu.matmul %17, %19, %cst_15 {dimension_numbers = #tpu.dot_dimension_numbers<[1], [0], [0], [1], [0, 0, 1, 1], [], []>} : vector<8x128xbf16>, vector<128x128xbf16>, vector<8x128xf32> -> vector<8x128xf32>
    %c2 = arith.constant 2 : index
    %c0_16 = arith.constant 0 : index
    %21 = vector.load %arg5[%c2, %c0_16] : memref<8x128xf32, #tpu.memory_space<vmem>>, vector<1x128xf32>
    %22 = vector.broadcast %21 : vector<1x128xf32> to vector<8x128xf32>
    %23 = arith.addf %20, %22 : vector<8x128xf32>
    %cst_17 = arith.constant 0.000000e+00 : f32
    %24 = vector.broadcast %cst_17 : f32 to vector<8x128xf32>
    %25 = arith.maximumf %23, %24 : vector<8x128xf32>
    %26 = arith.truncf %25 : vector<8x128xf32> to vector<8x128xbf16>
    %c2_18 = arith.constant 2 : index
    %c0_19 = arith.constant 0 : index
    %c0_20 = arith.constant 0 : index
    %27 = vector.load %arg3[%c2_18, %c0_19, %c0_20] : memref<3x128x128xbf16, #tpu.memory_space<vmem>>, vector<1x128x128xbf16>
    %28 = vector.shape_cast %27 : vector<1x128x128xbf16> to vector<128x128xbf16>
    %cst_21 = arith.constant dense<0.000000e+00> : vector<8x128xf32>
    %29 = tpu.matmul %26, %28, %cst_21 {dimension_numbers = #tpu.dot_dimension_numbers<[1], [0], [0], [1], [0, 0, 1, 1], [], []>} : vector<8x128xbf16>, vector<128x128xbf16>, vector<8x128xf32> -> vector<8x128xf32>
    %c3 = arith.constant 3 : index
    %c0_22 = arith.constant 0 : index
    %30 = vector.load %arg5[%c3, %c0_22] : memref<8x128xf32, #tpu.memory_space<vmem>>, vector<1x128xf32>
    %31 = vector.broadcast %30 : vector<1x128xf32> to vector<8x128xf32>
    %32 = arith.addf %29, %31 : vector<8x128xf32>
    %cst_23 = arith.constant 0.000000e+00 : f32
    %33 = vector.broadcast %cst_23 : f32 to vector<8x128xf32>
    %34 = arith.maximumf %32, %33 : vector<8x128xf32>
    %35 = arith.truncf %34 : vector<8x128xf32> to vector<8x128xbf16>
    %c0_24 = arith.constant 0 : index
    %c0_25 = arith.constant 0 : index
    %36 = vector.load %arg4[%c0_24, %c0_25] : memref<128x128xbf16, #tpu.memory_space<vmem>>, vector<128x128xbf16>
    %cst_26 = arith.constant dense<0.000000e+00> : vector<8x128xf32>
    %37 = tpu.matmul %35, %36, %cst_26 {dimension_numbers = #tpu.dot_dimension_numbers<[1], [0], [0], [1], [0, 0, 1, 1], [], []>} : vector<8x128xbf16>, vector<128x128xbf16>, vector<8x128xf32> -> vector<8x128xf32>
    %c4 = arith.constant 4 : index
    %c0_27 = arith.constant 0 : index
    %38 = vector.load %arg5[%c4, %c0_27] : memref<8x128xf32, #tpu.memory_space<vmem>>, vector<1x128xf32>
    %39 = vector.broadcast %38 : vector<1x128xf32> to vector<8x128xf32>
    %40 = arith.addf %37, %39 : vector<8x128xf32>
    %c0_28 = arith.constant 0 : index
    %c0_29 = arith.constant 0 : index
    %41 = vector.load %arg6[%c0_28, %c0_29] : memref<8x128xf32, #tpu.memory_space<vmem>>, vector<8x128xf32>
    tpu.vector_store %arg6[%c0_28, %c0_29], %40 {strides = array<i32>} : memref<8x128xf32, #tpu.memory_space<vmem>>, vector<8x128xf32>,
    return
  }
  func.func @transform_0(%arg0: i32) -> (i32, i32) {
    %c0_i32 = arith.constant 0 : i32
    %c0_i32_0 = arith.constant 0 : i32
    return %arg0, %c0_i32 : i32, i32
  }
  func.func @transform_1(%arg0: i32) -> (i32, i32) {
    %c0_i32 = arith.constant 0 : i32
    %c0_i32_0 = arith.constant 0 : i32
    %c0_i32_1 = arith.constant 0 : i32
    return %c0_i32, %c0_i32_0 : i32, i32
  }
  func.func @transform_2(%arg0: i32) -> (i32, i32, i32) {
    %c0_i32 = arith.constant 0 : i32
    %c0_i32_0 = arith.constant 0 : i32
    %c0_i32_1 = arith.constant 0 : i32
    %c0_i32_2 = arith.constant 0 : i32
    return %c0_i32, %c0_i32_0, %c0_i32_1 : i32, i32, i32
  }
  func.func @transform_3(%arg0: i32) -> (i32, i32) {
    %c0_i32 = arith.constant 0 : i32
    %c0_i32_0 = arith.constant 0 : i32
    %c0_i32_1 = arith.constant 0 : i32
    return %c0_i32, %c0_i32_0 : i32, i32
  }
  func.func @transform_4(%arg0: i32) -> (i32, i32) {
    %c0_i32 = arith.constant 0 : i32
    %c0_i32_0 = arith.constant 0 : i32
    %c0_i32_1 = arith.constant 0 : i32
    return %c0_i32, %c0_i32_0 : i32, i32
  }
  func.func @transform_5(%arg0: i32) -> (i32, i32) {
    %c0_i32 = arith.constant 0 : i32
    %c0_i32_0 = arith.constant 0 : i32
    return %arg0, %c0_i32 : i32, i32
  }
}

</mosaic_0001>

<bundles_post_ra>
// kernel: _lambda_.1
= control target key start
LH: loop header
LB: loop body
LE: loop exit
PB: predicated region body
PF: predicated region fallthrough
CT: control target
= control target key end

     0   :  { %10 = vsyncpa [#allocation3], 0  ;;  %s1125_s0 = inlined_call_operand.vmem [shape: bf16[8,256], index: 0, kind: input, shape index: {}]   ;;  %s1126_s1 = inlined_call_operand.hbm [shape: bf16[256,128], index: 1, kind: input, shape index: {}]   ;;  %s1127_s2 = inlined_call_operand.hbm [shape: bf16[3,128,128], index: 2, kind: input, shape index: {}]   ;;  %s1128_s3 = inlined_call_operand.vmem [shape: bf16[128,128], index: 3, kind: input, shape index: {}]   ;;  %s1129_s4 = inlined_call_operand.vmem [shape: f32[8,128], index: 4, kind: input, shape index: {}]   ;;  %s1130_s5 = inlined_call_operand.vmem [shape: f32[8,128], index: 5, kind: output, shape index: {}]  }
   0x1   :  { %11 = vsyncpa [#allocation5], 0  ;;  %s980_s18 = smov [#allocation2]   ;;  %s932_s22 = scalar_lea.hbm %s1126_s1, 2048 }
   0x2   :  { %s19_s19 = sshll.u32 %s980_s18, 4  ;;  %p933_p0 = scmp.ne.s32.totalorder %s1126_s1, %s932_s22  ;;  %s20_s19 = int_to_ptr.vmem [resolvable:$true] %s19_s19 }
   0x3   :  { %p936_p1 = scmp.lt.u32.totalorder %s932_s22, %s1126_s1 }
   0x5   :  { %p938_p2 = pnand %p936_p1, %p933_p0 }
   0x7   :  { %941 = shalt.err (!%p938_p2)
}
   0x8   :  { %s942_s27 = scalar_lea.vmem %s20_s19, 2048  ;;  %p947_p4 = scmp.lt.s32.totalorder %s20_s19, %s20_s19 }
   0x9   :  { %p943_p3 = scmp.ne.s32.totalorder %s20_s19, %s942_s27  ;;  %p948_p5 = scmp.lt.s32.totalorder %s942_s27, %s942_s27 }
   0xb   :  { %p949_p6 = por %p948_p5, %p947_p4 }
   0xd   :  { %p950_p7 = pnand %p949_p6, %p943_p3 }
   0xf   :  { %953 = shalt.err (!%p950_p7)
}
  0x10   :  { %s981_s28 = smov 64   ;;  %s982_s29 = smov 4  }
  0x11   :  { %25 = dma.hbm_to_vmem [thread:$0]  %s1126_s1, 2048, %s20_s19, [#allocation3], %s981_s28, %s981_s28, %s982_s29  }
  0x12   :  { %s983_s7 = smov [#allocation4]   ;;  %s954_s11 = scalar_lea.hbm %s1127_s2, 3072 }
  0x13   :  { %s31_s8 = sshll.u32 %s983_s7, 4  ;;  %p955_p8 = scmp.ne.s32.totalorder %s1127_s2, %s954_s11  ;;  %s32_s8 = int_to_ptr.vmem [resolvable:$true] %s31_s8 }
  0x14   :  { %p958_p9 = scmp.lt.u32.totalorder %s954_s11, %s1127_s2 }
  0x16   :  { %p960_p10 = pnand %p958_p9, %p955_p8 }
  0x18   :  { %963 = shalt.err (!%p960_p10)
}
  0x19   :  { %s964_s16 = scalar_lea.vmem %s32_s8, 3072  ;;  %p969_p12 = scmp.lt.s32.totalorder %s32_s8, %s32_s8 }
  0x1a   :  { %p965_p11 = scmp.ne.s32.totalorder %s32_s8, %s964_s16  ;;  %p970_p13 = scmp.lt.s32.totalorder %s964_s16, %s964_s16 }
  0x1c   :  { %p971_p0 = por %p970_p13, %p969_p12 }
  0x1e   :  { %p972_p1 = pnand %p971_p0, %p965_p11 }
  0x20   :  { %975 = shalt.err (!%p972_p1)
}
  0x21   :  { %37 = dma.hbm_to_vmem [thread:$0]  %s1127_s2, 3072, %s32_s8, [#allocation5], %s981_s28, %s981_s28, %s982_s29  }
  0x22   :  { %976 = dma.done.wait [#allocation3], 2048  }
  0x23   :  { %977 = vsyncadd [#allocation3], 4294965248 }
  0x24   :  { %978 = dma.done.wait [#allocation5], 3072  }
  0x25   :  { %979 = vsyncadd [#allocation5], 4294964224  ;;  %v984_v0 = vmov 0.0   ;;  %v882_v1 = vld [vmem:[#allocation2 + $0x40] sm:$0xff]   ;;  %v884_v3 = vld [vmem:[#allocation2 + $0x48] sm:$0xff]   ;;  %vm985_vm0 = vmmov 0  }
  0x26   :  { %796 = vmatprep.subr.bf16.mxu1 %v984_v0  ;;  %v883_v2 = vld [vmem:[#allocation2] sm:$0xff]   ;;  %738 = vmatprep.subr.bf16.mxu0 %v882_v1  ;;  %v885_v4 = vld [vmem:[#allocation2 + $0x8] sm:$0xff]   ;;  %v886_v5 = vld [vmem:[#allocation2 + $0x50] sm:$0xff]  }
  0x27   :  { %739 = vmatpush3.bf16.msra.mxu0 %v883_v2  ;;  %v887_v6 = vld [vmem:[#allocation2 + $0x10] sm:$0xff]   ;;  %v888_v7 = vld [vmem:[#allocation2 + $0x58] sm:$0xff]   ;;  %v890_v9 = vld [vmem:[#allocation2 + $0x60] sm:$0xff]   ;;  %812 = vmatprep.mubr.msk.bf16.mxu1 %vm985_vm0, %v984_v0 }
  0x28   :  { %740 = vmatprep.subr.bf16.mxu0 %v884_v3  ;;  %v889_v8 = vld [vmem:[#allocation2 + $0x18] sm:$0xff]   ;;  %v891_v10 = vld [vmem:[#allocation2 + $0x20] sm:$0xff]   ;;  %v892_v11 = vld [vmem:[#allocation2 + $0x68] sm:$0xff]  }
  0x29   :  { %v49_v12 = vld [vmem:[%s1125_s0] sm:$0xff]  ;;  %v893_v15 = vld [vmem:[#allocation2 + $0x28] sm:$0xff]   ;;  %v894_v16 = vld [vmem:[#allocation2 + $0x70] sm:$0xff]  }
  0x2a   :  { %v685_v13 = vcombine.high %v49_v12, %v49_v12  ;;  %v900_v14 = vld [vmem:[#allocation4] sm:$0xff]   ;;  %v901_v17 = vld [vmem:[#allocation4 + $0x8] sm:$0xff]   ;;  %v895_v18 = vld [vmem:[#allocation2 + $0x30] sm:$0xff]   ;;  %v684_v23 = vcombine.low %v49_v12, %v49_v12 }
  0x2b   :  { %741 = vmatpush3.bf16.msra.mxu0 %v885_v4  ;;  %797 = vmatpush3.bf16.msra.mxu1 %v900_v14  ;;  %v896_v19 = vld [vmem:[#allocation2 + $0x78] sm:$0xff]   ;;  %v902_v20 = vld [vmem:[#allocation4 + $0x10] sm:$0xff]   ;;  %v904_v24 = vld [vmem:[#allocation4 + $0x20] sm:$0xff]  }
  0x2c   :  { %742 = vmatprep.subr.bf16.mxu0 %v886_v5  ;;  %222 = vmatprep.mubr.bf16.mxu0 %v685_v13  ;;  %v897_v21 = vld [vmem:[#allocation2 + $0x38] sm:$0xff]   ;;  %v905_v25 = vld [vmem:[#allocation4 + $0x28] sm:$0xff]   ;;  %v906_v26 = vld [vmem:[#allocation4 + $0x30] sm:$0xff]  }
  0x2d   :  { %798 = vmatprep.subr.bf16.mxu1 %v984_v0  ;;  %v903_v22 = vld [vmem:[#allocation4 + $0x18] sm:$0xff]   ;;  %v908_v28 = vld [vmem:[#allocation4 + $0x40] sm:$0xff]   ;;  %v909_v29 = vld [vmem:[#allocation4 + $0x48] sm:$0xff]  }
  0x2e   :  { %v907_v27 = vld [vmem:[#allocation4 + $0x38] sm:$0xff]   ;;  %v910_v30 = vld [vmem:[#allocation4 + $0x50] sm:$0xff]   ;;  %v912_v32 = vld [vmem:[#allocation4 + $0x60] sm:$0xff]  }
  0x2f   :  { %743 = vmatpush3.bf16.msra.mxu0 %v887_v6  ;;  %799 = vmatpush3.bf16.msra.mxu1 %v901_v17  ;;  %v911_v31 = vld [vmem:[#allocation4 + $0x58] sm:$0xff]   ;;  %v913_v33 = vld [vmem:[#allocation4 + $0x68] sm:$0xff]   ;;  %v683_v35 = vld [vmem:[%s1129_s4] ss:$0 sm:$0xff] }
  0x30   :  { %744 = vmatprep.subr.bf16.mxu0 %v888_v7  ;;  %800 = vmatprep.subr.bf16.mxu1 %v984_v0  ;;  %v914_v43 = vld [vmem:[#allocation4 + $0x70] sm:$0xff]   ;;  %v915_v44 = vld [vmem:[#allocation4 + $0x78] sm:$0xff]   ;;  %v916_v45 = vld [vmem:[#allocation4 + $0x80] sm:$0xff]  }
  0x31   :  { %v917_v46 = vld [vmem:[#allocation4 + $0x88] sm:$0xff]   ;;  %v918_v47 = vld [vmem:[#allocation4 + $0x90] sm:$0xff]   ;;  %v919_v48 = vld [vmem:[#allocation4 + $0x98] sm:$0xff]  }
  0x32   :  { %v920_v49 = vld [vmem:[#allocation4 + $0xa0] sm:$0xff]   ;;  %v921_v50 = vld [vmem:[#allocation4 + $0xa8] sm:$0xff]   ;;  %v922_v59 = vld [vmem:[#allocation4 + $0xb0] sm:$0xff]  }
  0x33   :  { %745 = vmatpush3.bf16.msra.mxu0 %v889_v8  ;;  %801 = vmatpush3.bf16.msra.mxu1 %v902_v20  ;;  %v702_v51 = vld [vmem:[%s1129_s4 + $0x1] ss:$0 sm:$0xff]  ;;  %v923_v60 = vld [vmem:[#allocation4 + $0xb8] sm:$0xff]   ;;  %v925_v62 = vld [vmem:[%s1128_s3 + $0x8] sm:$0xff]  }
  0x34   :  { %746 = vmatprep.subr.bf16.mxu0 %v890_v9  ;;  %802 = vmatprep.subr.bf16.mxu1 %v984_v0  ;;  %v924_v61 = vld [vmem:[%s1128_s3] sm:$0xff]   ;;  %v926_v63 = vld [vmem:[%s1128_s3 + $0x10] sm:$0xff]   ;;  %v927_v1 = vld [vmem:[%s1128_s3 + $0x18] sm:$0xff]  }
  0x35   :  { %v928_v2 = vld [vmem:[%s1128_s3 + $0x20] sm:$0xff]   ;;  %v929_v3 = vld [vmem:[%s1128_s3 + $0x28] sm:$0xff]   ;;  %v930_v12 = vld [vmem:[%s1128_s3 + $0x30] sm:$0xff]  }
  0x36   :  { %v711_v4 = vld [vmem:[%s1129_s4 + $0x2] ss:$0 sm:$0xff]  ;;  %v931_v13 = vld [vmem:[%s1128_s3 + $0x38] sm:$0xff]   ;;  %v720_v14 = vld [vmem:[%s1129_s4 + $0x3] ss:$0 sm:$0xff] }
  0x37   :  { %747 = vmatpush3.bf16.msra.mxu0 %v891_v10  ;;  %803 = vmatpush3.bf16.msra.mxu1 %v903_v22 }
  0x38   :  { %748 = vmatprep.subr.bf16.mxu0 %v892_v11  ;;  %804 = vmatprep.subr.bf16.mxu1 %v984_v0 }
  0x3b   :  { %749 = vmatpush3.bf16.msra.mxu0 %v893_v15  ;;  %805 = vmatpush3.bf16.msra.mxu1 %v904_v24 }
  0x3c   :  { %750 = vmatprep.subr.bf16.mxu0 %v894_v16  ;;  %806 = vmatprep.subr.bf16.mxu1 %v984_v0 }
  0x3f   :  { %751 = vmatpush3.bf16.msra.mxu0 %v895_v18  ;;  %807 = vmatpush3.bf16.msra.mxu1 %v905_v25 }
  0x40   :  { %752 = vmatprep.subr.bf16.mxu0 %v896_v19  ;;  %808 = vmatprep.subr.bf16.mxu1 %v984_v0 }
  0x43   :  { %753 = vmatpush3.bf16.msra.mxu0 %v897_v21  ;;  %809 = vmatpush3.bf16.msra.mxu1 %v906_v26 }
  0x44   :  { %816 = vmatprep.subr.bf16.mxu0 %v984_v0  ;;  %810 = vmatprep.subr.bf16.mxu1 %v984_v0 }
  0x46   :  { %223 = vmatmul.mubr.bf16.vlgmr.msra.gmra.mrb[0].mxu0 %v684_v23 }
  0x47   :  { %811 = vmatpush3.bf16.msra.mxu1 %v907_v27  ;;  %832 = vmatprep.mubr.msk.bf16.mxu0 %vm985_vm0, %v984_v0 }
  0x48   :  { %836 = vmatprep.subr.bf16.mxu1 %v984_v0  ;;  %817 = vmatpush3.bf16.msra.mxu0 %v908_v28 }
  0x49   :  { %818 = vmatprep.subr.bf16.mxu0 %v984_v0 }
  0x4c   :  { %819 = vmatpush3.bf16.msra.mxu0 %v909_v29 }
  0x4d   :  { %820 = vmatprep.subr.bf16.mxu0 %v984_v0 }
  0x50   :  { %821 = vmatpush3.bf16.msra.mxu0 %v910_v30 }
  0x51   :  { %822 = vmatprep.subr.bf16.mxu0 %v984_v0 }
  0x54   :  { %823 = vmatpush3.bf16.msra.mxu0 %v911_v31 }
  0x55   :  { %824 = vmatprep.subr.bf16.mxu0 %v984_v0 }
  0x58   :  { %825 = vmatpush3.bf16.msra.mxu0 %v912_v32 }
  0x59   :  { %826 = vmatprep.subr.bf16.mxu0 %v984_v0 }
  0x5c   :  { %827 = vmatpush3.bf16.msra.mxu0 %v913_v33 }
  0x5d   :  { %828 = vmatprep.subr.bf16.mxu0 %v984_v0 }
  0x60   :  { %829 = vmatpush3.bf16.msra.mxu0 %v914_v43 }
  0x61   :  { %830 = vmatprep.subr.bf16.mxu0 %v984_v0 }
  0x64   :  { %831 = vmatpush3.bf16.msra.mxu0 %v915_v44 }
  0x65   :  { %856 = vmatprep.subr.bf16.mxu0 %v984_v0 }
 0x119   :  { %v754_v34 = vpop.f32.mrb[0].mxu0 }
 0x11a   :  { %v755_v36 = vpop.f32.mrb[1].mxu0 }
 0x11b   :  { %v756_v37 = vadd.f32 %v755_v36, %v754_v34  ;;  %v757_v38 = vpop.f32.mrb[2].mxu0 }
 0x11c   :  { %v758_v39 = vpop.f32.mrb[3].mxu0 }
 0x11d   :  { %v225_v40 = vadd.f32 %v756_v37, %v683_v35 }
 0x11f   :  { %v230_v41 = vmax.f32 %v225_v40, 0.0 }
 0x121   :  { %v231_v42 = vpack.c.bf16 %v230_v41, %v230_v41 }
 0x123   :  { %813 = vmatmul.mubr.bf16.vlgmr.msra.gmra.mrb[0].mxu1 %v231_v42 }
 0x124   :  { %852 = vmatprep.mubr.msk.bf16.mxu1 %vm985_vm0, %v984_v0  ;;  %837 = vmatpush3.bf16.msra.mxu1 %v916_v45 }
 0x125   :  { %838 = vmatprep.subr.bf16.mxu1 %v984_v0 }
 0x128   :  { %839 = vmatpush3.bf16.msra.mxu1 %v917_v46 }
 0x129   :  { %840 = vmatprep.subr.bf16.mxu1 %v984_v0 }
 0x12c   :  { %841 = vmatpush3.bf16.msra.mxu1 %v918_v47 }
 0x12d   :  { %842 = vmatprep.subr.bf16.mxu1 %v984_v0 }
 0x130   :  { %843 = vmatpush3.bf16.msra.mxu1 %v919_v48 }
 0x131   :  { %844 = vmatprep.subr.bf16.mxu1 %v984_v0 }
 0x134   :  { %845 = vmatpush3.bf16.msra.mxu1 %v920_v49 }
 0x135   :  { %846 = vmatprep.subr.bf16.mxu1 %v984_v0 }
 0x138   :  { %847 = vmatpush3.bf16.msra.mxu1 %v921_v50 }
 0x139   :  { %848 = vmatprep.subr.bf16.mxu1 %v984_v0 }
 0x13c   :  { %849 = vmatpush3.bf16.msra.mxu1 %v922_v59 }
 0x13d   :  { %850 = vmatprep.subr.bf16.mxu1 %v984_v0 }
 0x140   :  { %851 = vmatpush3.bf16.msra.mxu1 %v923_v60 }
 0x1f6   :  { %v335_v52 = vpop.f32.mrb[0].mxu1 }
 0x1f7   :  { %v336_v53 = vadd.f32 %v702_v51, %v335_v52  ;;  %v814_v54 = vpop.f32.mrb[1].mxu1 }
 0x1f8   :  { %v338_v55 = vpop.f32.mrb[2].mxu1 }
 0x1f9   :  { %v341_v56 = vmax.f32 %v336_v53, 0.0  ;;  %v815_v57 = vpop.f32.mrb[3].mxu1 }
 0x1fb   :  { %v342_v58 = vpack.c.bf16 %v341_v56, %v341_v56 }
 0x1fd   :  { %833 = vmatmul.mubr.bf16.vlgmr.msra.gmra.mrb[4].mxu0 %v342_v58 }
 0x1fe   :  { %872 = vmatprep.mubr.msk.bf16.mxu0 %vm985_vm0, %v984_v0  ;;  %857 = vmatpush3.bf16.msra.mxu0 %v924_v61 }
 0x1ff   :  { %858 = vmatprep.subr.bf16.mxu0 %v984_v0 }
 0x202   :  { %859 = vmatpush3.bf16.msra.mxu0 %v925_v62 }
 0x203   :  { %860 = vmatprep.subr.bf16.mxu0 %v984_v0 }
 0x206   :  { %861 = vmatpush3.bf16.msra.mxu0 %v926_v63 }
 0x207   :  { %862 = vmatprep.subr.bf16.mxu0 %v984_v0 }
 0x20a   :  { %863 = vmatpush3.bf16.msra.mxu0 %v927_v1 }
 0x20b   :  { %864 = vmatprep.subr.bf16.mxu0 %v984_v0 }
 0x20e   :  { %865 = vmatpush3.bf16.msra.mxu0 %v928_v2 }
 0x20f   :  { %866 = vmatprep.subr.bf16.mxu0 %v984_v0 }
 0x212   :  { %867 = vmatpush3.bf16.msra.mxu0 %v929_v3 }
 0x213   :  { %868 = vmatprep.subr.bf16.mxu0 %v984_v0 }
 0x216   :  { %869 = vmatpush3.bf16.msra.mxu0 %v930_v12 }
 0x217   :  { %870 = vmatprep.subr.bf16.mxu0 %v984_v0  ;;  %v729_v0 = vld [vmem:[%s1129_s4 + $0x4] ss:$0 sm:$0xff] }
 0x21a   :  { %871 = vmatpush3.bf16.msra.mxu0 %v931_v13 }
 0x2d0   :  { %v447_v5 = vpop.f32.mrb[4].mxu0 }
 0x2d1   :  { %v448_v6 = vadd.f32 %v711_v4, %v447_v5  ;;  %v834_v7 = vpop.f32.mrb[5].mxu0 }
 0x2d2   :  { %v450_v8 = vpop.f32.mrb[6].mxu0 }
 0x2d3   :  { %v453_v9 = vmax.f32 %v448_v6, 0.0  ;;  %v835_v10 = vpop.f32.mrb[7].mxu0 }
 0x2d5   :  { %v454_v11 = vpack.c.bf16 %v453_v9, %v453_v9 }
 0x2d7   :  { %853 = vmatmul.mubr.bf16.vlgmr.msra.gmra.mrb[4].mxu1 %v454_v11 }
 0x3aa   :  { %v559_v15 = vpop.f32.mrb[4].mxu1 }
 0x3ab   :  { %v560_v16 = vadd.f32 %v720_v14, %v559_v15  ;;  %v854_v17 = vpop.f32.mrb[5].mxu1 }
 0x3ac   :  { %v562_v18 = vpop.f32.mrb[6].mxu1 }
 0x3ad   :  { %v565_v19 = vmax.f32 %v560_v16, 0.0  ;;  %v855_v20 = vpop.f32.mrb[7].mxu1 }
 0x3af   :  { %v566_v21 = vpack.c.bf16 %v565_v19, %v565_v19 }
 0x3b1   :  { %873 = vmatmul.mubr.bf16.vlgmr.msra.gmra.mrb[8].mxu0 %v566_v21 }
 0x484   :  { %v670_v22 = vpop.f32.mrb[8].mxu0 }
 0x485   :  { %v671_v23 = vadd.f32 %v729_v0, %v670_v22  ;;  %v874_v24 = vpop.f32.mrb[9].mxu0 }
 0x486   :  { %v673_v25 = vpop.f32.mrb[10].mxu0 }
 0x487   :  { %676 = vst [vmem:[%s1130_s5] sm:$0xff] %v671_v23  ;;  %v875_v26 = vpop.f32.mrb[11].mxu0 }
 0x488   :  { %681 = vsyncpa [#allocation3], 1 }
 0x489   :  { %682 = vsyncpa [#allocation5], 1 }

</bundles_post_ra>
